<compile_context>
chip_gen: v7x
topology: tpu7x:2x2x1
jax: 0.10.0
libtpu: 0.0.40
codegen_flags: <defaults>
</compile_context>

<pallas_src>
import jax
import jax.numpy as jnp
from jax.experimental import pallas as pl
from jax.experimental.pallas import tpu as pltpu


def _clipping_kernel(cr_ref, x_ref, o_ref):
    """x_ref / o_ref: (tR, 2M) interleaved real/imag rows; cr_ref: (1,) in SMEM."""
    x = x_ref[...].astype(jnp.float32)
    cr = cr_ref[0]

    s = x * x                                   # per-element square, (tR, 2M)
    n = s.shape[-1]                             # 2M (static)

    # Partner lane's square: lane 2k pairs with 2k+1 and vice versa.  The
    # wrap-around lanes of each roll are never selected by the parity mask.
    nxt = pltpu.roll(s, shift=n - 1, axis=1)    # nxt[j] = s[(j + 1) % n]
    prv = pltpu.roll(s, shift=1, axis=1)        # prv[j] = s[(j - 1) % n]
    lane = jax.lax.broadcasted_iota(jnp.int32, s.shape, 1)
    pwr = s + jnp.where((lane & 1) == 0, nxt, prv)   # |x_k|^2 on both lanes of pair k

    # sigma = sqrt(mean(x^2 over (M,2)) * 2) = sqrt(sum(s, lanes) * 2 / (2M))
    cr_sigma = cr * jnp.sqrt(jnp.sum(s, axis=1, keepdims=True) * (2.0 / n))  # (tR, 1)

    # scale = min(CR * sigma / amp, 1), sqrt + divide fused into one rsqrt.
    scale = jnp.minimum(cr_sigma * jax.lax.rsqrt(pwr), 1.0)

    o_ref[...] = (x * scale).astype(o_ref.dtype)


def _pick_row_tile(R, n_lanes, itemsize):
    """Largest legal row tile within a ~16 MiB VMEM pipeline budget.

    Budget covers double-buffered input + output (native dtype) plus ~6 f32
    temporaries per block; 16 MiB keeps us safely inside v7x's 32 MiB scoped /
    64 MiB physical VMEM (v5e/v6e have more headroom).
    """
    budget = 16 * 1024 * 1024
    per_row = n_lanes * (4 * itemsize + 6 * 4)
    cap = min(2048, max(8, budget // max(per_row, 1)))
    if R <= cap:
        # Whole array fits in one block; if it splits cleanly in two, do so:
        # keeps the grid >= 2 so both v7x TensorCores get work (the extra grid
        # step is ~0.35 us, negligible on single-TC v5e/v6e).
        if R >= 16 and R % 16 == 0:
            return R // 2
        return R
    if R % 8 != 0:
        return R          # rare: keep a single full block so the BlockSpec stays legal
    t = (cap // 8) * 8
    while t > 8 and R % t != 0:
        t -= 8
    return t


def clipping(x, cr):
    """x: (..., M, 2) float array. Returns x * min(sigma * CR / amp, 1)."""
    orig_shape = x.shape
    assert orig_shape[-1] == 2, "last dim must be (real, imag)"
    M = orig_shape[-2]
    R = 1
    for d in orig_shape[:-2]:
        R *= d
    n = 2 * M

    # Contiguous view: merges the (M, 2) minor axes into one interleaved lane
    # axis.  No data movement -- the kernel is fed exactly what sits in HBM.
    x2 = x.reshape(R, n)

    tR = _pick_row_tile(R, n, x.dtype.itemsize)
    grid = (R // tR,)

    cr_arr = jnp.asarray(cr, dtype=jnp.float32).reshape(1)

    out2 = pl.pallas_call(
        _clipping_kernel,
        out_shape=jax.ShapeDtypeStruct((R, n), x.dtype),
        grid_spec=pltpu.PrefetchScalarGridSpec(
            num_scalar_prefetch=0,
            grid=grid,
            in_specs=[
                pl.BlockSpec(memory_space=pltpu.MemorySpace.SMEM),   # CR scalar
                pl.BlockSpec((tR, n), lambda i: (i, 0)),             # interleaved rows
            ],
            out_specs=pl.BlockSpec((tR, n), lambda i: (i, 0)),
        ),
        compiler_params=pltpu.CompilerParams(
            dimension_semantics=("parallel",),
            vmem_limit_bytes=32 * 1024 * 1024,
        ),
    )(cr_arr, x2)

    return out2.reshape(orig_shape)


def clipping_ref(x, cr):
    """Pure-JAX reference mirroring the PyTorch forward."""
    amp = jnp.sqrt(jnp.sum(x ** 2, -1, keepdims=True))
    sigma = jnp.sqrt(jnp.mean(x ** 2, axis=(-2, -1), keepdims=True) * 2.0)
    ratio = sigma * cr / amp
    scale = jnp.minimum(ratio, jnp.ones_like(ratio))
    return x * scale


if __name__ == "__main__":
    # Deterministic setup (module has no learned weights; only opt.CR).
    CR = 1.0

    key = jax.random.PRNGKey(0)
    # x: (batch=2, pilots=4, symbols=64, 2) -- (..., M, 2) complex-as-last-dim
    x = jax.random.normal(key, (2, 4, 64, 2), dtype=jnp.float32)

    out = clipping(x, CR)
    out = jax.block_until_ready(out)

    ref = clipping_ref(x, CR)
    assert out.shape == x.shape and out.dtype == x.dtype
    assert jnp.allclose(out, ref, atol=1e-5, rtol=1e-5)

    print("KERNEL_OK")
</pallas_src>

<mosaic_0001>
module attributes {stable_mosaic.version = 11 : i64} {
  func.func @_clipping_kernel(%arg0: i32, %arg1: memref<1xf32, #tpu.memory_space<smem>>, %arg2: memref<8x128xf32, #tpu.memory_space<vmem>>, %arg3: memref<8x128xf32, #tpu.memory_space<vmem>>) attributes {dimension_semantics = [#tpu.dimension_semantics<parallel>], iteration_bounds = array<i64: 1>, scalar_prefetch = 0 : i64, scratch_operands = 0 : i64, tpu.core_type = #tpu.core_type<tc>, window_params = [{transform_indices = @transform_0, window_bounds = array<i64: 1>}, {transform_indices = @transform_1, window_bounds = array<i64: 8, 128>}, {transform_indices = @transform_2, window_bounds = array<i64: 8, 128>}]} {
    %c0 = arith.constant 0 : index
    %c0_0 = arith.constant 0 : index
    %0 = vector.load %arg2[%c0, %c0_0] : memref<8x128xf32, #tpu.memory_space<vmem>>, vector<8x128xf32>
    %c0_1 = arith.constant 0 : index
    %1 = memref.load %arg1[%c0_1] : memref<1xf32, #tpu.memory_space<smem>>
    %2 = arith.mulf %0, %0 : vector<8x128xf32>
    %c127_i32 = arith.constant 127 : i32
    %3 = tpu.dynamic_rotate %2 by %c127_i32 dim 1 : vector<8x128xf32>, i32 -> vector<8x128xf32>
    %c1_i32 = arith.constant 1 : i32
    %4 = tpu.dynamic_rotate %2 by %c1_i32 dim 1 : vector<8x128xf32>, i32 -> vector<8x128xf32>
    %5 = tpu.iota {dimensions = array<i32: 1>} : vector<8x128xi32>
    %c1_i32_2 = arith.constant 1 : i32
    %6 = vector.broadcast %c1_i32_2 : i32 to vector<8x128xi32>
    %7 = arith.andi %5, %6 : vector<8x128xi32>
    %c0_i32 = arith.constant 0 : i32
    %8 = vector.broadcast %c0_i32 : i32 to vector<8x128xi32>
    %9 = arith.cmpi eq, %7, %8 : vector<8x128xi32>
    %10 = arith.select %9, %3, %4 : vector<8x128xi1>, vector<8x128xf32>
    %11 = arith.addf %2, %10 : vector<8x128xf32>
    %cst = arith.constant dense<0.000000e+00> : vector<8xf32>
    %12 = vector.multi_reduction <add>, %2, %cst [1] : vector<8x128xf32> to vector<8xf32>
    %13 = vector.shape_cast %12 : vector<8xf32> to vector<8x1xf32>
    %cst_3 = arith.constant 1.562500e-02 : f32
    %14 = vector.broadcast %cst_3 : f32 to vector<8x1xf32>
    %15 = arith.mulf %13, %14 : vector<8x1xf32>
    %16 = math.sqrt %15 : vector<8x1xf32>
    %17 = vector.broadcast %1 : f32 to vector<8x1xf32>
    %18 = arith.mulf %17, %16 : vector<8x1xf32>
    %19 = math.rsqrt %11 : vector<8x128xf32>
    %20 = vector.broadcast %18 : vector<8x1xf32> to vector<8x128xf32>
    %21 = arith.mulf %20, %19 : vector<8x128xf32>
    %cst_4 = arith.constant 1.000000e+00 : f32
    %22 = vector.broadcast %cst_4 : f32 to vector<8x128xf32>
    %23 = arith.minimumf %21, %22 : vector<8x128xf32>
    %24 = arith.mulf %0, %23 : vector<8x128xf32>
    %c0_5 = arith.constant 0 : index
    %c0_6 = arith.constant 0 : index
    %25 = vector.load %arg3[%c0_5, %c0_6] : memref<8x128xf32, #tpu.memory_space<vmem>>, vector<8x128xf32>
    tpu.vector_store %arg3[%c0_5, %c0_6], %24 {strides = array<i32>} : memref<8x128xf32, #tpu.memory_space<vmem>>, vector<8x128xf32>,
    return
  }
  func.func @transform_0(%arg0: i32) -> i32 {
    %c0_i32 = arith.constant 0 : i32
    %c0_i32_0 = arith.constant 0 : i32
    return %c0_i32 : i32
  }
  func.func @transform_1(%arg0: i32) -> (i32, i32) {
    %c0_i32 = arith.constant 0 : i32
    %c0_i32_0 = arith.constant 0 : i32
    return %arg0, %c0_i32 : i32, i32
  }
  func.func @transform_2(%arg0: i32) -> (i32, i32) {
    %c0_i32 = arith.constant 0 : i32
    %c0_i32_0 = arith.constant 0 : i32
    return %arg0, %c0_i32 : i32, i32
  }
}

</mosaic_0001>

<bundles_post_ra>
// kernel: tpu_custom_call.1
= control target key start
LH: loop header
LB: loop body
LE: loop exit
PB: predicated region body
PF: predicated region fallthrough
CT: control target
= control target key end

     0   :  { %8 = vsyncpa [#allocation4], 0  ;;  %s172_s0 = inlined_call_operand.<no memory space> [shape: f32[1], index: 0, kind: input, shape index: {}]   ;;  %s173_s1 = inlined_call_operand.hbm [shape: f32[8,128], index: 1, kind: input, shape index: {}]   ;;  %s174_s2 = inlined_call_operand.hbm [shape: f32[8,128], index: 2, kind: output, shape index: {}]  }
   0x1   :  { %9 = vsyncpa [#allocation5], 0  ;;  %s126_s9 = smov [#allocation3]   ;;  %s78_s13 = scalar_lea.hbm %s173_s1, 128 }
   0x2   :  { %s18_s10 = sshll.u32 %s126_s9, 4  ;;  %p79_p0 = scmp.ne.s32.totalorder %s173_s1, %s78_s13  ;;  %s19_s10 = int_to_ptr.vmem [resolvable:$true] %s18_s10 }
   0x3   :  { %p82_p1 = scmp.lt.u32.totalorder %s78_s13, %s173_s1 }
   0x5   :  { %p84_p2 = pnand %p82_p1, %p79_p0 }
   0x7   :  { %87 = shalt.err (!%p84_p2)
}
   0x8   :  { %s88_s18 = scalar_lea.vmem %s19_s10, 128  ;;  %p93_p4 = scmp.lt.s32.totalorder %s19_s10, %s19_s10 }
   0x9   :  { %p89_p3 = scmp.ne.s32.totalorder %s19_s10, %s88_s18  ;;  %p94_p5 = scmp.lt.s32.totalorder %s88_s18, %s88_s18 }
   0xb   :  { %p95_p6 = por %p94_p5, %p93_p4 }
   0xd   :  { %p96_p7 = pnand %p95_p6, %p89_p3 }
   0xf   :  { %99 = shalt.err (!%p96_p7)
}
  0x10   :  { %21 = dma.hbm_to_vmem [thread:$0]  %s173_s1, 128, %s19_s10, [#allocation4]  }
  0x11   :  { %122 = dma.done.wait [#allocation4], 128  }
  0x12   :  { %123 = vsyncadd [#allocation4], 4294967168  ;;  %v25_v0 = vld [vmem:[#allocation3] sm:$0xff]  ;;  %s127_s21 = smov 1   ;;  %s128_s22 = smov 127   ;;  %v32_v2 = vlaneseq  ;;  %v48_v14 = vstv %s172_s0 }
  0x13   :  { %v27_v1 = vmul.f32 %v25_v0, %v25_v0  ;;  %s129_s24 = smov [#allocation6]  }
  0x14   :  { %v33_v3 = vand.u32 127, %v32_v2  ;;  %s61_s25 = sshll.u32 %s129_s24, 4  ;;  %s62_s25 = int_to_ptr.vmem [resolvable:$true] %s61_s25 }
  0x15   :  { %38 = vadd.xlane.f32.xlu0 %v27_v1  ;;  %30 = vrot.lane.b32.xlu1 %v27_v1, %s127_s21  ;;  %s100_s26 = scalar_lea.vmem %s62_s25, 128  ;;  %p105_p9 = scmp.lt.s32.totalorder %s62_s25, %s62_s25 }
  0x16   :  { %v34_v4 = vand.u32 1, %v33_v3  ;;  %p101_p8 = scmp.ne.s32.totalorder %s62_s25, %s100_s26  ;;  %p106_p10 = scmp.lt.s32.totalorder %s100_s26, %s100_s26 }
  0x18   :  { %vm35_vm0 = vcmp.eq.s32.totalorder %v34_v4, 0  ;;  %p107_p11 = por %p106_p10, %p105_p9 }
  0x1a   :  { %p108_p12 = pnand %p107_p11, %p101_p8 }
  0x2b   :  { %28 = vrot.lane.b32.xlu0 %v27_v1, %s128_s22 }
  0x87   :  { %v31_v7 = vpop.permute.xlu1 %30 }
  0xa2   :  { %v39_v5 = vpop.xlane.xlu0 %38 }
  0xa3   :  { %v40_v6 = vmul.f32 0.015625, %v39_v5 }
  0xa5   :  { %74 = vrsqrt.f32 %v40_v6  ;;  %vm43_vm1 = vcmp.eq.f32.partialorder %v40_v6, inf  ;;  %v46_v13 = vand.u32 2147483648, %v40_v6  ;;  %vm45_vm2 = vcmp.eq.f32.partialorder %v40_v6, 0.0 }
  0xa6   :  { %v29_v8 = vpop.permute.xlu0 %28 }
  0xa7   :  { %v36_v9 = vsel %vm35_vm0, %v29_v8, %v31_v7 }
  0xa8   :  { %v37_v10 = vadd.f32 %v36_v9, %v27_v1 }
  0xaa   :  { %76 = vrsqrt.f32 %v37_v10 }
  0xaf   :  { %v75_v11 = vpop.eup %74 }
  0xb0   :  { %v42_v12 = vmul.f32 %v75_v11, %v40_v6 }
  0xb2   :  { %v44_v15 = vsel %vm43_vm1, %v40_v6, %v42_v12 }
  0xb3   :  { %v47_v16 = vsel %vm45_vm2, %v46_v13, %v44_v15 }
  0xb4   :  { %v77_v17 = vpop.eup %76  ;;  %v49_v18 = vmul.f32 %v48_v14, %v47_v16 }
  0xb6   :  { %v51_v19 = vmul.f32 %v77_v17, %v49_v18 }
  0xb8   :  { %v52_v20 = vmin.f32 %v51_v19, 1.0 }
  0xba   :  { %v53_v21 = vmul.f32 %v52_v20, %v25_v0 }
  0xbc   :  { %54 = vst [vmem:[#allocation6] sm:$0xff] %v53_v21 }
  0xbd   :  { %111 = shalt.err (!%p108_p12)
}
  0xbe   :  { %s112_s28 = scalar_lea.hbm %s174_s2, 128 }
  0xbf   :  { %p113_p13 = scmp.ne.s32.totalorder %s174_s2, %s112_s28  ;;  %p116_p0 = scmp.lt.u32.totalorder %s112_s28, %s174_s2 }
  0xc1   :  { %p118_p1 = pnand %p116_p0, %p113_p13 }
  0xc3   :  { %121 = shalt.err (!%p118_p1)
}
  0xc4   :  { %64 = dma.vmem_to_hbm [thread:$0]  %s62_s25, 128, %s174_s2, [#allocation5]  }
  0xc5   :  { %124 = dma.done.wait [#allocation5], 128  }
  0xc6   :  { %125 = vsyncadd [#allocation5], 4294967168 }
  0xc7   :  { %68 = vsyncpa [#allocation4], 1 }
  0xc8   :  { %69 = vsyncpa [#allocation5], 1 }

</bundles_post_ra>
